<compile_context>
chip_gen: v7x
topology: tpu7x:2x2x1
jax: 0.10.0
libtpu: 0.0.40
codegen_flags: <defaults>
</compile_context>

<pallas_src>
import jax
import jax.numpy as jnp
from jax.experimental import pallas as pl
from jax.experimental.pallas import tpu as pltpu


# --------------------------------------------------------------------------- #
# helpers
# --------------------------------------------------------------------------- #
def _round_up(x, m):
    return ((x + m - 1) // m) * m


def _vmem_budget_bytes():
    """Per-generation VMEM budget for the pipelined working set."""
    try:
        cap = int(pltpu.get_tpu_info().vmem_capacity_bytes)
    except Exception:  # no TPU info available -> be conservative (v7x per-TC)
        cap = 64 * 1024 * 1024
    # ~75% of physical VMEM (keeps double-buffering intact on v7x's 64 MiB),
    # capped at ~100 MiB on 128 MiB parts (v5e/v6e).
    return min((cap * 3) // 4, 100 * 1024 * 1024)


def _largest_div_tile(total, cap):
    """Largest multiple of 128 that divides `total` (a multiple of 128) and is <= cap."""
    cap = max(128, min(cap, total))
    best = 128
    for t in range(128, cap + 1, 128):
        if total % t == 0:
            best = t
    return best


def _pick_tiles(M, N_pad, K_pad, budget, in_isz, out_isz):
    """Budget-aware (tm, tn, tk). tk/tn always divide K_pad/N_pad exactly
    (the K axis is a reduction, so no partial K blocks are ever used)."""

    def ws(tm, tn, tk):
        # double-buffered x, w, out tiles + bias tile
        return 2 * (tm * tk * in_isz + tk * tn * in_isz + tm * tn * out_isz + tn * 4)

    # Never force an M split: every extra M tile re-streams the full weight on
    # single-TC chips. Only split when M itself is very large.
    tm = M if M <= 1024 else 512          # 512 is a multiple of 16 (bf16 row packing)

    # Best case: whole weight is a single resident block (fetched once, only
    # x and the output stream).
    if ws(tm, N_pad, K_pad) <= budget:
        return tm, N_pad, K_pad

    tn = _largest_div_tile(N_pad, 2048)
    tk = _largest_div_tile(K_pad, 2048)
    while ws(tm, tn, tk) > budget:
        if tk > 128:
            tk = _largest_div_tile(K_pad, tk // 2)
        elif tn > 128:
            tn = _largest_div_tile(N_pad, tn // 2)
        elif tm > 16:
            tm = max(16, _round_up(tm // 2, 16))
        else:
            break
    return tm, tn, tk


# --------------------------------------------------------------------------- #
# kernel
# --------------------------------------------------------------------------- #
def linear_relu_kernel(x_ref, w_ref, b_ref, o_ref):
    # x_ref: (tm, tk) compute dtype    w_ref: (tk, tn) compute dtype
    # b_ref: (1, tn) f32               o_ref: (tm, tn) f32 (resident across k)
    k = pl.program_id(2)

    @pl.when(k == 0)
    def _():
        o_ref[...] = jnp.zeros_like(o_ref)

    o_ref[...] += jnp.dot(x_ref[...], w_ref[...],
                          preferred_element_type=jnp.float32)

    @pl.when(k == pl.num_programs(2) - 1)
    def _():
        o_ref[...] = jnp.maximum(o_ref[...] + b_ref[...], 0.0)


# --------------------------------------------------------------------------- #
# parameter prep (one-time, at init) + forward wrapper
# --------------------------------------------------------------------------- #
def prepare_mlp_params(weight, bias, *, compute_dtype=jnp.bfloat16):
    """One-time prep of nn.Linear params (do at init, NOT per forward call):
       zero-pad (N, K) to multiples of 128, transpose to (K_pad, N_pad),
       cast to the compute dtype (bf16 halves operand DMA; use jnp.float32
       here if exact f32 parity with the PyTorch forward is required)."""
    N, K = weight.shape
    assert bias.shape == (N,)
    N_pad = _round_up(max(N, 128), 128)
    K_pad = _round_up(max(K, 128), 128)
    w = weight
    if N_pad != N or K_pad != K:
        w = jnp.pad(w, ((0, N_pad - N), (0, K_pad - K)))
    w_t = jnp.asarray(w.T, dtype=compute_dtype)            # (K_pad, N_pad), canonical MXU feed
    b2d = jnp.pad(bias, (0, N_pad - N)).astype(jnp.float32).reshape(1, N_pad)
    return dict(w_t=w_t, b2d=b2d, N=N, K=K, N_pad=N_pad, K_pad=K_pad,
                compute_dtype=compute_dtype)


def mlp_fc_layer(x, params, *, use_pallas=None, tm=None, tn=None, tk=None):
    """relu(x @ weight.T + bias) with pre-prepared params (see prepare_mlp_params)."""
    w_t, b2d = params["w_t"], params["b2d"]
    N, K = params["N"], params["K"]
    N_pad, K_pad = params["N_pad"], params["K_pad"]
    cdt = params["compute_dtype"]
    in_isz = jnp.dtype(cdt).itemsize

    orig_shape = x.shape
    assert orig_shape[-1] == K
    x2 = x.reshape(-1, K)
    M = x2.shape[0]

    if use_pallas is None:
        # Tiny layers: a fused XLA dot+relu is strictly faster than kernel launch.
        use_pallas = 2 * M * N_pad * K_pad >= (1 << 24)

    x_c = x2.astype(cdt)
    if K_pad != K:
        # TODO(synk): keep activations pre-padded to K_pad upstream so this
        # per-call zero-pad (exact: adds zero contributions) disappears.
        x_c = jnp.pad(x_c, ((0, 0), (0, K_pad - K)))

    if not use_pallas:
        out = jnp.maximum(
            jnp.dot(x_c, w_t, preferred_element_type=jnp.float32) + b2d, 0.0)
    else:
        budget = _vmem_budget_bytes()
        a_tm, a_tn, a_tk = _pick_tiles(M, N_pad, K_pad, budget, in_isz, 4)
        tm = tm or a_tm
        tn = tn or a_tn
        tk = tk or a_tk

        grid = (pl.cdiv(M, tm), N_pad // tn, K_pad // tk)
        n_i, n_j, n_k = grid

        # HBM traffic under this grid: x re-read once per N tile, weight (and
        # bias) re-read once per M tile, f32 output written once.
        bytes_accessed = int(M * K_pad * in_isz * n_j
                             + K_pad * N_pad * in_isz * n_i
                             + N_pad * 4 * n_i
                             + M * N_pad * 4)
        cost = pl.CostEstimate(flops=2 * M * N_pad * K_pad,
                               bytes_accessed=bytes_accessed,
                               transcendentals=0)

        # TODO(synk): if a profile shows exposed weight-DMA (short per-k compute),
        # add pipeline_mode=pl.Buffered(3) on the weight BlockSpec and sweep 2 vs 3.
        out = pl.pallas_call(
            linear_relu_kernel,
            out_shape=jax.ShapeDtypeStruct((M, N_pad), jnp.float32),
            grid_spec=pltpu.PrefetchScalarGridSpec(
                num_scalar_prefetch=0,
                grid=grid,
                in_specs=[
                    pl.BlockSpec((tm, tk), lambda i, j, k: (i, k)),   # x tile
                    pl.BlockSpec((tk, tn), lambda i, j, k: (k, j)),   # weight tile (K, N)
                    pl.BlockSpec((1, tn), lambda i, j, k: (0, j)),    # bias tile
                ],
                out_specs=pl.BlockSpec((tm, tn), lambda i, j, k: (i, j)),
            ),
            compiler_params=pltpu.CompilerParams(
                dimension_semantics=("parallel", "parallel", "arbitrary"),
                vmem_limit_bytes=int(budget)),
            cost_estimate=cost,
        )(x_c, w_t, b2d)

    out = out[:, :N] if N_pad != N else out
    out = out.astype(x.dtype)
    return out.reshape(orig_shape[:-1] + (N,))


# --------------------------------------------------------------------------- #
# demo / correctness check
# --------------------------------------------------------------------------- #
if __name__ == "__main__":
    # Small shapes consistent with the module: batch=8, hidden_input=32, hidden_output=64.
    M, hidden_input, hidden_output = 8, 32, 64

    key = jax.random.PRNGKey(0)
    kx, kw, kb = jax.random.split(key, 3)

    x = jax.random.normal(kx, (M, hidden_input), dtype=jnp.float32)
    bound = 1.0 / (hidden_input ** 0.5)
    weight = jax.random.uniform(kw, (hidden_output, hidden_input),
                                minval=-bound, maxval=bound, dtype=jnp.float32)
    bias = jax.random.uniform(kb, (hidden_output,),
                              minval=-bound, maxval=bound, dtype=jnp.float32)

    params = prepare_mlp_params(weight, bias)          # one-time init-side prep
    out = mlp_fc_layer(x, params, use_pallas=True)     # force the Pallas path at demo size
    jax.block_until_ready(out)

    # Reference with matching bf16 operand rounding + f32 accumulation (tight),
    # plus pure-f32 reference of the PyTorch forward (loose, bf16 operands).
    ref_bf16 = jnp.maximum(
        jnp.dot(x.astype(jnp.bfloat16), weight.astype(jnp.bfloat16).T,
                preferred_element_type=jnp.float32) + bias, 0.0)
    ref_f32 = jnp.maximum(x @ weight.T + bias, 0.0)

    assert out.shape == (M, hidden_output)
    assert out.dtype == jnp.float32
    assert jnp.allclose(out, ref_bf16, atol=1e-4, rtol=1e-4)
    assert jnp.allclose(out, ref_f32, atol=5e-2, rtol=5e-2)

    print("KERNEL_OK")
</pallas_src>

<mosaic_0001>
module attributes {stable_mosaic.version = 11 : i64} {
  func.func @linear_relu_kernel(%arg0: i32, %arg1: i32, %arg2: i32, %arg3: memref<8x128xbf16, #tpu.memory_space<vmem>>, %arg4: memref<128x128xbf16, #tpu.memory_space<vmem>>, %arg5: memref<1x128xf32, #tpu.memory_space<vmem>>, %arg6: memref<8x128xf32, #tpu.memory_space<vmem>>) attributes {dimension_semantics = [#tpu.dimension_semantics<parallel>, #tpu.dimension_semantics<parallel>, #tpu.dimension_semantics<arbitrary>], iteration_bounds = array<i64: 1, 1, 1>, scalar_prefetch = 0 : i64, scratch_operands = 0 : i64, tpu.core_type = #tpu.core_type<tc>, window_params = [{transform_indices = @transform_0, window_bounds = array<i64: 8, 128>}, {transform_indices = @transform_1, window_bounds = array<i64: 128, 128>}, {transform_indices = @transform_2, window_bounds = array<i64: 1, 128>}, {transform_indices = @transform_3, window_bounds = array<i64: 8, 128>}]} {
    %c0_i32 = arith.constant 0 : i32
    %0 = arith.cmpi eq, %arg2, %c0_i32 : i32
    %1 = arith.extui %0 : i1 to i32
    %c0_i32_0 = arith.constant 0 : i32
    %2 = arith.cmpi ne, %1, %c0_i32_0 : i32
    scf.if %2 {
      %cst_10 = arith.constant 0.000000e+00 : f32
      %12 = vector.broadcast %cst_10 : f32 to vector<8x128xf32>
      %c0_11 = arith.constant 0 : index
      %c0_12 = arith.constant 0 : index
      %13 = vector.load %arg6[%c0_11, %c0_12] : memref<8x128xf32, #tpu.memory_space<vmem>>, vector<8x128xf32>
      tpu.vector_store %arg6[%c0_11, %c0_12], %12 {strides = array<i32>} : memref<8x128xf32, #tpu.memory_space<vmem>>, vector<8x128xf32>,
    } else {
    }
    %c0 = arith.constant 0 : index
    %c0_1 = arith.constant 0 : index
    %3 = vector.load %arg6[%c0, %c0_1] : memref<8x128xf32, #tpu.memory_space<vmem>>, vector<8x128xf32>
    %c0_2 = arith.constant 0 : index
    %c0_3 = arith.constant 0 : index
    %4 = vector.load %arg3[%c0_2, %c0_3] : memref<8x128xbf16, #tpu.memory_space<vmem>>, vector<8x128xbf16>
    %c0_4 = arith.constant 0 : index
    %c0_5 = arith.constant 0 : index
    %5 = vector.load %arg4[%c0_4, %c0_5] : memref<128x128xbf16, #tpu.memory_space<vmem>>, vector<128x128xbf16>
    %cst = arith.constant dense<0.000000e+00> : vector<8x128xf32>
    %6 = tpu.matmul %4, %5, %cst {dimension_numbers = #tpu.dot_dimension_numbers<[1], [0], [0], [1], [0, 0, 1, 1], [], []>} : vector<8x128xbf16>, vector<128x128xbf16>, vector<8x128xf32> -> vector<8x128xf32>
    %7 = arith.addf %3, %6 : vector<8x128xf32>
    %c0_6 = arith.constant 0 : index
    %c0_7 = arith.constant 0 : index
    %8 = vector.load %arg6[%c0_6, %c0_7] : memref<8x128xf32, #tpu.memory_space<vmem>>, vector<8x128xf32>
    tpu.vector_store %arg6[%c0_6, %c0_7], %7 {strides = array<i32>} : memref<8x128xf32, #tpu.memory_space<vmem>>, vector<8x128xf32>,
    %c0_i32_8 = arith.constant 0 : i32
    %9 = arith.cmpi eq, %arg2, %c0_i32_8 : i32
    %10 = arith.extui %9 : i1 to i32
    %c0_i32_9 = arith.constant 0 : i32
    %11 = arith.cmpi ne, %10, %c0_i32_9 : i32
    scf.if %11 {
      %c0_10 = arith.constant 0 : index
      %c0_11 = arith.constant 0 : index
      %12 = vector.load %arg6[%c0_10, %c0_11] : memref<8x128xf32, #tpu.memory_space<vmem>>, vector<8x128xf32>
      %c0_12 = arith.constant 0 : index
      %c0_13 = arith.constant 0 : index
      %13 = vector.load %arg5[%c0_12, %c0_13] : memref<1x128xf32, #tpu.memory_space<vmem>>, vector<1x128xf32>
      %14 = vector.broadcast %13 : vector<1x128xf32> to vector<8x128xf32>
      %15 = arith.addf %12, %14 : vector<8x128xf32>
      %cst_14 = arith.constant 0.000000e+00 : f32
      %16 = vector.broadcast %cst_14 : f32 to vector<8x128xf32>
      %17 = arith.maximumf %15, %16 : vector<8x128xf32>
      %c0_15 = arith.constant 0 : index
      %c0_16 = arith.constant 0 : index
      %18 = vector.load %arg6[%c0_15, %c0_16] : memref<8x128xf32, #tpu.memory_space<vmem>>, vector<8x128xf32>
      tpu.vector_store %arg6[%c0_15, %c0_16], %17 {strides = array<i32>} : memref<8x128xf32, #tpu.memory_space<vmem>>, vector<8x128xf32>,
    } else {
    }
    return
  }
  func.func @transform_0(%arg0: i32, %arg1: i32, %arg2: i32) -> (i32, i32) {
    %c0_i32 = arith.constant 0 : i32
    return %arg0, %arg2 : i32, i32
  }
  func.func @transform_1(%arg0: i32, %arg1: i32, %arg2: i32) -> (i32, i32) {
    %c0_i32 = arith.constant 0 : i32
    return %arg2, %arg1 : i32, i32
  }
  func.func @transform_2(%arg0: i32, %arg1: i32, %arg2: i32) -> (i32, i32) {
    %c0_i32 = arith.constant 0 : i32
    %c0_i32_0 = arith.constant 0 : i32
    return %c0_i32, %arg1 : i32, i32
  }
  func.func @transform_3(%arg0: i32, %arg1: i32, %arg2: i32) -> (i32, i32) {
    %c0_i32 = arith.constant 0 : i32
    return %arg0, %arg1 : i32, i32
  }
}

</mosaic_0001>

<bundles_post_ra>
// kernel: tpu_custom_call.1
= control target key start
LH: loop header
LB: loop body
LE: loop exit
PB: predicated region body
PF: predicated region fallthrough
CT: control target
= control target key end

     0   :  { %8 = vsyncpa [#allocation3], 0  ;;  %s383_s0 = inlined_call_operand.hbm [shape: bf16[8,128], index: 0, kind: input, shape index: {}]   ;;  %s384_s1 = inlined_call_operand.hbm [shape: bf16[128,128], index: 1, kind: input, shape index: {}]   ;;  %s385_s2 = inlined_call_operand.vmem [shape: f32[1,128], index: 2, kind: input, shape index: {}]   ;;  %s386_s3 = inlined_call_operand.hbm [shape: f32[8,128], index: 3, kind: output, shape index: {}]  }
   0x1   :  { %9 = vsyncpa [#allocation6], 0 }
   0x2   :  { %10 = vsyncpa [#allocation4], 0  ;;  %s310_s12 = smov [#allocation2]   ;;  %s311_s14 = smov [#allocation5]  }
   0x3   :  { %s17_s13 = sshll.u32 %s310_s12, 4  ;;  %s26_s15 = sshll.u32 %s311_s14, 4  ;;  %s18_s13 = int_to_ptr.vmem [resolvable:$true] %s17_s13  ;;  %s337_s15 = int_to_ptr.vmem [resolvable:$true] %s26_s15 }
   0x4   :  { %s238_s18 = scalar_lea.hbm %s383_s0, 64 }
   0x5   :  { %p239_p0 = scmp.ne.s32.totalorder %s383_s0, %s238_s18  ;;  %p242_p1 = scmp.lt.u32.totalorder %s238_s18, %s383_s0 }
   0x7   :  { %p244_p2 = pnand %p242_p1, %p239_p0 }
   0x9   :  { %247 = shalt.err (!%p244_p2)
}
   0xa   :  { %s248_s23 = scalar_lea.vmem %s18_s13, 64  ;;  %p253_p4 = scmp.lt.s32.totalorder %s18_s13, %s18_s13 }
   0xb   :  { %p249_p3 = scmp.ne.s32.totalorder %s18_s13, %s248_s23  ;;  %p254_p5 = scmp.lt.s32.totalorder %s248_s23, %s248_s23 }
   0xd   :  { %p255_p6 = por %p254_p5, %p253_p4 }
   0xf   :  { %p256_p7 = pnand %p255_p6, %p249_p3 }
  0x11   :  { %259 = shalt.err (!%p256_p7)
}
  0x12   :  { %20 = dma.hbm_to_vmem [thread:$0]  %s383_s0, 64, %s18_s13, [#allocation3]  }
  0x13   :  { %s260_s28 = scalar_lea.hbm %s384_s1, 1024 }
  0x14   :  { %p261_p8 = scmp.ne.s32.totalorder %s384_s1, %s260_s28  ;;  %p264_p9 = scmp.lt.u32.totalorder %s260_s28, %s384_s1 }
  0x16   :  { %p266_p10 = pnand %p264_p9, %p261_p8 }
  0x18   :  { %269 = shalt.err (!%p266_p10)
}
  0x19   :  { %s270_s6 = scalar_lea.vmem %s337_s15, 1024  ;;  %p275_p12 = scmp.lt.s32.totalorder %s337_s15, %s337_s15 }
  0x1a   :  { %p271_p11 = scmp.ne.s32.totalorder %s337_s15, %s270_s6  ;;  %p276_p13 = scmp.lt.s32.totalorder %s270_s6, %s270_s6 }
  0x1c   :  { %p277_p0 = por %p276_p13, %p275_p12 }
  0x1e   :  { %p278_p1 = pnand %p277_p0, %p271_p11 }
  0x20   :  { %281 = shalt.err (!%p278_p1)
}
  0x21   :  { %s312_s0 = smov 64   ;;  %s313_s7 = smov 4  }
  0x22   :  { %32 = dma.hbm_to_vmem [thread:$0]  %s384_s1, 1024, %s337_s15, [#allocation6], %s312_s0, %s312_s0, %s313_s7  }
  0x23   :  { %304 = dma.done.wait [#allocation3], 64  }
  0x24   :  { %305 = vsyncadd [#allocation3], 4294967232 }
  0x25   :  { %306 = dma.done.wait [#allocation6], 1024  }
  0x26   :  { %307 = vsyncadd [#allocation6], 4294966272  ;;  %v314_v0 = vmov 0.0   ;;  %vm315_vm0 = vmmov 0   ;;  %v230_v1 = vld [vmem:[#allocation5] sm:$0xff]   ;;  %v231_v2 = vld [vmem:[#allocation5 + $0x8] sm:$0xff]  }
  0x27   :  { %203 = vmatprep.subr.bf16.mxu0 %v314_v0  ;;  %219 = vmatprep.mubr.msk.bf16.mxu0 %vm315_vm0, %v314_v0  ;;  %v232_v3 = vld [vmem:[#allocation5 + $0x10] sm:$0xff]   ;;  %v233_v4 = vld [vmem:[#allocation5 + $0x18] sm:$0xff]   ;;  %v234_v5 = vld [vmem:[#allocation5 + $0x20] sm:$0xff]   ;;  %s316_s11 = smov [#allocation7]  }
  0x28   :  { %204 = vmatpush3.bf16.msra.mxu0 %v230_v1  ;;  %v235_v6 = vld [vmem:[#allocation5 + $0x28] sm:$0xff]   ;;  %v236_v7 = vld [vmem:[#allocation5 + $0x30] sm:$0xff]   ;;  %v237_v8 = vld [vmem:[#allocation5 + $0x38] sm:$0xff]   ;;  %s175_s12 = sshll.u32 %s316_s11, 4  ;;  %s176_s12 = int_to_ptr.vmem [resolvable:$true] %s175_s12 }
  0x29   :  { %205 = vmatprep.subr.bf16.mxu0 %v314_v0  ;;  %v48_v9 = vld [vmem:[#allocation2] sm:$0xf]  ;;  %s282_s13 = scalar_lea.vmem %s176_s12, 128  ;;  %p287_p3 = scmp.lt.s32.totalorder %s176_s12, %s176_s12 }
  0x2a   :  { %v193_v11 = vld [vmem:[%s385_s2] ss:$0 sm:$0xff]  ;;  %p283_p2 = scmp.ne.s32.totalorder %s176_s12, %s282_s13  ;;  %p288_p4 = scmp.lt.s32.totalorder %s282_s13, %s282_s13 }
  0x2c   :  { %206 = vmatpush3.bf16.msra.mxu0 %v231_v2  ;;  %p289_p5 = por %p288_p4, %p287_p3 }
  0x2d   :  { %207 = vmatprep.subr.bf16.mxu0 %v314_v0 }
  0x2e   :  { %p290_p6 = pnand %p289_p5, %p283_p2 }
  0x30   :  { %208 = vmatpush3.bf16.msra.mxu0 %v232_v3 }
  0x31   :  { %209 = vmatprep.subr.bf16.mxu0 %v314_v0 }
  0x34   :  { %210 = vmatpush3.bf16.msra.mxu0 %v233_v4 }
  0x35   :  { %211 = vmatprep.subr.bf16.mxu0 %v314_v0 }
  0x38   :  { %212 = vmatpush3.bf16.msra.mxu0 %v234_v5 }
  0x39   :  { %213 = vmatprep.subr.bf16.mxu0 %v314_v0 }
  0x3c   :  { %214 = vmatpush3.bf16.msra.mxu0 %v235_v6 }
  0x3d   :  { %215 = vmatprep.subr.bf16.mxu0 %v314_v0 }
  0x40   :  { %216 = vmatpush3.bf16.msra.mxu0 %v236_v7 }
  0x41   :  { %217 = vmatprep.subr.bf16.mxu0 %v314_v0 }
  0x44   :  { %218 = vmatpush3.bf16.msra.mxu0 %v237_v8 }
  0x47   :  { %220 = vmatmul.mubr.bf16.vlgmr.msra.gmra.mrb[0].mxu0 %v48_v9 }
 0x11a   :  { %v147_v10 = vpop.f32.mrb[0].mxu0 }
 0x11b   :  { %v221_v12 = vpop.f32.mrb[1].mxu0  ;;  %v166_v15 = vadd.f32 %v193_v11, %v147_v10 }
 0x11c   :  { %v150_v13 = vpop.f32.mrb[2].mxu0 }
 0x11d   :  { %v222_v14 = vpop.f32.mrb[3].mxu0  ;;  %v167_v16 = vmax.f32 %v166_v15, 0.0 }
 0x11f   :  { %168 = vst [vmem:[#allocation7] sm:$0xff] %v167_v16 }
 0x120   :  { %293 = shalt.err (!%p290_p6)
}
 0x121   :  { %s294_s2 = scalar_lea.hbm %s386_s3, 128 }
 0x122   :  { %p295_p7 = scmp.ne.s32.totalorder %s386_s3, %s294_s2  ;;  %p298_p8 = scmp.lt.u32.totalorder %s294_s2, %s386_s3 }
 0x124   :  { %p300_p9 = pnand %p298_p8, %p295_p7 }
 0x126   :  { %303 = shalt.err (!%p300_p9)
}
 0x127   :  { %178 = dma.vmem_to_hbm [thread:$0]  %s176_s12, 128, %s386_s3, [#allocation4]  }
 0x128   :  { %308 = dma.done.wait [#allocation4], 128  }
 0x129   :  { %309 = vsyncadd [#allocation4], 4294967168 }
 0x12a   :  { %182 = vsyncpa [#allocation3], 1 }
 0x12b   :  { %183 = vsyncpa [#allocation6], 1 }
 0x12c   :  { %184 = vsyncpa [#allocation4], 1 }

</bundles_post_ra>
